<compile_context>
chip_gen: v7x
topology: tpu7x:2x2x1
jax: 0.10.0
libtpu: 0.0.40
codegen_flags: <defaults>
</compile_context>

<pallas_src>
import math

import jax
import jax.numpy as jnp
from jax.experimental import pallas as pl
from jax.experimental.pallas import tpu as pltpu

_IGNORE_INDEX = -100


def _make_ce_kernel(v_total, tv, mask_tail):
    """Streaming cross-entropy kernel over a (row-tile, vocab-chunk) grid."""

    def kernel(logits_ref, labels_ref, loss_ref, m_scr, s_scr, p_scr):
        j = pl.program_id(1)
        nj = pl.num_programs(1)

        @pl.when(j == 0)
        def _():
            m_scr[...] = jnp.full_like(m_scr, -jnp.inf)
            s_scr[...] = jnp.zeros_like(s_scr)
            p_scr[...] = jnp.zeros_like(p_scr)

        x = logits_ref[...]                       # (TM, TV), native dtype
        labels = labels_ref[...]                  # (TM, 1), int32
        col = jax.lax.broadcasted_iota(jnp.int32, x.shape, 1)   # chunk-local cols

        if mask_tail:
            rem = v_total - j * tv                # valid columns in this chunk
            tail_ok = col < rem
            x_for_max = jnp.where(tail_ok, x, jnp.array(-jnp.inf, dtype=x.dtype))
        else:
            x_for_max = x

        # --- online logsumexp update (max is exact in the native dtype) ---
        chunk_max = jnp.max(x_for_max, axis=-1, keepdims=True).astype(jnp.float32)
        m_old = m_scr[...]
        m_new = jnp.maximum(m_old, chunk_max)
        # Guard exp(-inf - -inf) = NaN on the first chunk (s_old is 0 there).
        alpha = jnp.where(m_old == -jnp.inf, 0.0, jnp.exp(m_old - m_new))
        e = jnp.exp(x.astype(jnp.float32) - m_new)    # f32 only for the exp operand
        if mask_tail:
            e = jnp.where(tail_ok, e, 0.0)
        s_scr[...] = s_scr[...] * alpha + jnp.sum(e, axis=-1, keepdims=True)
        m_scr[...] = m_new

        # --- logit at the label position (one-hot select, chunk-local compare) ---
        local_label = labels - j * tv             # (TM, 1); ignore rows never match
        picked = jnp.where(col == local_label, x, jnp.zeros_like(x))
        p_scr[...] = p_scr[...] + jnp.sum(
            picked, axis=-1, keepdims=True).astype(jnp.float32)

        # --- finalize this row tile ---
        @pl.when(j == nj - 1)
        def _():
            valid = labels != _IGNORE_INDEX
            lse = m_scr[...] + jnp.log(s_scr[...])
            # jnp.where (not multiply-by-zero) so garbage tail rows / ignored rows
            # cannot inject NaN/Inf into the final sum.
            loss_ref[...] = jnp.where(valid, lse - p_scr[...], 0.0)

    return kernel


def _round_up(x, m):
    return ((x + m - 1) // m) * m


def _vmem_capacity_bytes():
    try:
        return int(pltpu.get_tpu_info().vmem_capacity_bytes)
    except Exception:
        return None


def _choose_tiles(n_rows, vocab, itemsize):
    # Vocab chunk: whole vocab when small (single lane-dense chunk), else 2048
    # lanes with cdiv chunking + in-kernel tail-column masking.
    if vocab <= 8192:
        tv = vocab
        mask_tail = False
    else:
        tv = 2048
        mask_tail = (vocab % tv != 0)

    # Generation-aware byte budget per logits block (Pallas double-buffers it).
    vmem_cap = _vmem_capacity_bytes()
    if vmem_cap is not None and vmem_cap >= 100 * 1024 * 1024:   # v5e / v6e (128 MiB)
        budget_bytes = 8 * 1024 * 1024
        vmem_limit = 96 * 1024 * 1024
    else:                                                        # v7x (64 MiB) / unknown
        budget_bytes = 4 * 1024 * 1024
        vmem_limit = 48 * 1024 * 1024

    row_mult = max(8, 32 // itemsize)             # 8 for f32, 16 for bf16
    tm = max(row_mult, budget_bytes // max(1, tv * itemsize))
    tm = max(row_mult, (tm // row_mult) * row_mult)
    tm = min(tm, _round_up(n_rows, row_mult))     # no fixed row cap — cap by bytes
    return tm, tv, mask_tail, vmem_limit


def masked_lm_loss(logits, labels, ylens=None):
    """logits: (..., V); labels: (...). Mean CE over labels != -100 (PyTorch default)."""
    del ylens  # unused by the forward pass, kept for signature parity
    *lead, V = logits.shape
    N = math.prod(lead) if lead else 1
    logits2d = logits.reshape(N, V)
    labels1d = labels.reshape(N).astype(jnp.int32)

    itemsize = jnp.dtype(logits.dtype).itemsize
    TM, TV, mask_tail, vmem_limit = _choose_tiles(N, V, itemsize)

    # Pad ONLY the tiny labels array (logits are never copied/padded in HBM);
    # padded rows get -100 so the in-kernel `valid` mask drops them.
    Np = _round_up(N, TM)
    labels2d = labels1d.reshape(N, 1)
    if Np != N:
        labels2d = jnp.concatenate(
            [labels2d, jnp.full((Np - N, 1), _IGNORE_INDEX, jnp.int32)], axis=0)

    grid = (Np // TM, pl.cdiv(V, TV))

    per_row_loss = pl.pallas_call(
        _make_ce_kernel(V, TV, mask_tail),
        out_shape=jax.ShapeDtypeStruct((Np, 1), jnp.float32),
        grid_spec=pltpu.PrefetchScalarGridSpec(
            num_scalar_prefetch=0,
            grid=grid,
            in_specs=[
                pl.BlockSpec((TM, TV), lambda i, j: (i, j)),
                pl.BlockSpec((TM, 1), lambda i, j: (i, 0)),
            ],
            out_specs=pl.BlockSpec((TM, 1), lambda i, j: (i, 0)),
            scratch_shapes=[
                pltpu.VMEM((TM, 1), jnp.float32),   # running max
                pltpu.VMEM((TM, 1), jnp.float32),   # running sum-exp
                pltpu.VMEM((TM, 1), jnp.float32),   # picked logit
            ],
        ),
        compiler_params=pltpu.CompilerParams(
            # Row tiles are independent -> "parallel" lets v7x megacore split them
            # across both TensorCores; vocab reduction stays last and "arbitrary".
            dimension_semantics=("parallel", "arbitrary"),
            vmem_limit_bytes=vmem_limit,
        ),
    )(logits2d, labels2d)

    # reduction='mean' over valid tokens; NaN if all ignored (matches PyTorch).
    count = jnp.sum((labels1d != _IGNORE_INDEX).astype(jnp.float32))
    return jnp.sum(per_row_loss) / count


if __name__ == "__main__":
    key = jax.random.PRNGKey(0)

    def ref_loss(lg, lb):
        V = lg.shape[-1]
        lg2 = lg.reshape(-1, V).astype(jnp.float32)
        lb1 = lb.reshape(-1)
        valid = lb1 != _IGNORE_INDEX
        lp = jax.nn.log_softmax(lg2, axis=-1)
        picked = lp[jnp.arange(lg2.shape[0]), jnp.where(valid, lb1, 0)]
        return -jnp.sum(jnp.where(valid, picked, 0.0)) / jnp.sum(valid)

    # Case 1: small dense case (all labels valid), module-style inputs.
    B, T, V = 2, 8, 128
    k1, k2, k3, k4, k5, k6 = jax.random.split(key, 6)
    logits = jax.random.normal(k1, (B, T, V), dtype=jnp.float32)
    labels = jax.random.randint(k2, (B, T), 0, V, dtype=jnp.int32)
    ylens = jnp.full((B,), T, dtype=jnp.int32)  # unused by forward
    loss = masked_lm_loss(logits, labels, ylens)
    jax.block_until_ready(loss)
    assert jnp.allclose(loss, ref_loss(logits, labels), atol=1e-5, rtol=1e-5), (
        loss, ref_loss(logits, labels))

    # Case 2: N not a row-tile multiple (tail rows masked in-kernel) + ignore_index.
    B2, T2, V2 = 2, 9, 384
    logits2 = jax.random.normal(k3, (B2, T2, V2), dtype=jnp.float32)
    labels2 = jax.random.randint(k4, (B2, T2), 0, V2, dtype=jnp.int32)
    labels2 = labels2.at[0, 3].set(_IGNORE_INDEX).at[1, 7].set(_IGNORE_INDEX)
    loss2 = masked_lm_loss(logits2, labels2)
    jax.block_until_ready(loss2)
    assert jnp.allclose(loss2, ref_loss(logits2, labels2), atol=1e-5, rtol=1e-5), (
        loss2, ref_loss(logits2, labels2))

    # Case 3: chunked-vocab path (V > 8192, V % 2048 != 0 -> in-kernel tail-column mask).
    B3, T3, V3 = 3, 8, 10000
    logits3 = jax.random.normal(k5, (B3, T3, V3), dtype=jnp.float32)
    labels3 = jax.random.randint(k6, (B3, T3), 0, V3, dtype=jnp.int32)
    labels3 = labels3.at[1, 2].set(_IGNORE_INDEX)
    loss3 = masked_lm_loss(logits3, labels3)
    jax.block_until_ready(loss3)
    assert jnp.allclose(loss3, ref_loss(logits3, labels3), atol=1e-4, rtol=1e-4), (
        loss3, ref_loss(logits3, labels3))

    print("KERNEL_OK")
</pallas_src>

<mosaic_0001>
module attributes {stable_mosaic.version = 11 : i64} {
  func.func @kernel(%arg0: i32, %arg1: i32, %arg2: memref<16x128xf32, #tpu.memory_space<vmem>>, %arg3: memref<16x1xi32, #tpu.memory_space<vmem>>, %arg4: memref<16x1xf32, #tpu.memory_space<vmem>>, %arg5: memref<16x1xf32, #tpu.memory_space<vmem>>, %arg6: memref<16x1xf32, #tpu.memory_space<vmem>>, %arg7: memref<16x1xf32, #tpu.memory_space<vmem>>) attributes {dimension_semantics = [#tpu.dimension_semantics<parallel>, #tpu.dimension_semantics<arbitrary>], iteration_bounds = array<i64: 1, 1>, scalar_prefetch = 0 : i64, scratch_operands = 3 : i64, tpu.core_type = #tpu.core_type<tc>, window_params = [{transform_indices = @transform_0, window_bounds = array<i64: 16, 128>}, {transform_indices = @transform_1, window_bounds = array<i64: 16, 1>}, {transform_indices = @transform_2, window_bounds = array<i64: 16, 1>}]} {
    %c0_i32 = arith.constant 0 : i32
    %0 = arith.cmpi eq, %arg1, %c0_i32 : i32
    %1 = arith.extui %0 : i1 to i32
    %c0_i32_0 = arith.constant 0 : i32
    %2 = arith.cmpi ne, %1, %c0_i32_0 : i32
    scf.if %2 {
      %cst_23 = arith.constant 0xFF800000 : f32
      %41 = vector.broadcast %cst_23 : f32 to vector<16x1xf32>
      %c0_24 = arith.constant 0 : index
      %c0_25 = arith.constant 0 : index
      %42 = vector.load %arg5[%c0_24, %c0_25] : memref<16x1xf32, #tpu.memory_space<vmem>>, vector<16x1xf32>
      tpu.vector_store %arg5[%c0_24, %c0_25], %41 {strides = array<i32>} : memref<16x1xf32, #tpu.memory_space<vmem>>, vector<16x1xf32>,
      %cst_26 = arith.constant 0.000000e+00 : f32
      %43 = vector.broadcast %cst_26 : f32 to vector<16x1xf32>
      %c0_27 = arith.constant 0 : index
      %c0_28 = arith.constant 0 : index
      %44 = vector.load %arg6[%c0_27, %c0_28] : memref<16x1xf32, #tpu.memory_space<vmem>>, vector<16x1xf32>
      tpu.vector_store %arg6[%c0_27, %c0_28], %43 {strides = array<i32>} : memref<16x1xf32, #tpu.memory_space<vmem>>, vector<16x1xf32>,
      %cst_29 = arith.constant 0.000000e+00 : f32
      %45 = vector.broadcast %cst_29 : f32 to vector<16x1xf32>
      %c0_30 = arith.constant 0 : index
      %c0_31 = arith.constant 0 : index
      %46 = vector.load %arg7[%c0_30, %c0_31] : memref<16x1xf32, #tpu.memory_space<vmem>>, vector<16x1xf32>
      tpu.vector_store %arg7[%c0_30, %c0_31], %45 {strides = array<i32>} : memref<16x1xf32, #tpu.memory_space<vmem>>, vector<16x1xf32>,
    } else {
    }
    %c0 = arith.constant 0 : index
    %c0_1 = arith.constant 0 : index
    %3 = vector.load %arg2[%c0, %c0_1] : memref<16x128xf32, #tpu.memory_space<vmem>>, vector<16x128xf32>
    %c0_2 = arith.constant 0 : index
    %c0_3 = arith.constant 0 : index
    %4 = vector.load %arg3[%c0_2, %c0_3] : memref<16x1xi32, #tpu.memory_space<vmem>>, vector<16x1xi32>
    %5 = tpu.iota {dimensions = array<i32: 1>} : vector<16x128xi32>
    %cst = arith.constant dense<0xFF800000> : vector<16xf32>
    %6 = vector.multi_reduction <maximumf>, %3, %cst [1] : vector<16x128xf32> to vector<16xf32>
    %7 = vector.shape_cast %6 : vector<16xf32> to vector<16x1xf32>
    %c0_4 = arith.constant 0 : index
    %c0_5 = arith.constant 0 : index
    %8 = vector.load %arg5[%c0_4, %c0_5] : memref<16x1xf32, #tpu.memory_space<vmem>>, vector<16x1xf32>
    %9 = arith.maximumf %8, %7 : vector<16x1xf32>
    %cst_6 = arith.constant 0xFF800000 : f32
    %10 = vector.broadcast %cst_6 : f32 to vector<16x1xf32>
    %11 = arith.cmpf oeq, %8, %10 : vector<16x1xf32>
    %12 = arith.subf %8, %9 : vector<16x1xf32>
    %13 = math.exp %12 : vector<16x1xf32>
    %cst_7 = arith.constant 0.000000e+00 : f32
    %14 = vector.broadcast %cst_7 : f32 to vector<16x1xf32>
    %15 = arith.select %11, %14, %13 : vector<16x1xi1>, vector<16x1xf32>
    %16 = vector.broadcast %9 : vector<16x1xf32> to vector<16x128xf32>
    %17 = arith.subf %3, %16 : vector<16x128xf32>
    %18 = math.exp %17 : vector<16x128xf32>
    %c0_8 = arith.constant 0 : index
    %c0_9 = arith.constant 0 : index
    %19 = vector.load %arg6[%c0_8, %c0_9] : memref<16x1xf32, #tpu.memory_space<vmem>>, vector<16x1xf32>
    %20 = arith.mulf %19, %15 : vector<16x1xf32>
    %cst_10 = arith.constant dense<0.000000e+00> : vector<16xf32>
    %21 = vector.multi_reduction <add>, %18, %cst_10 [1] : vector<16x128xf32> to vector<16xf32>
    %22 = vector.shape_cast %21 : vector<16xf32> to vector<16x1xf32>
    %23 = arith.addf %20, %22 : vector<16x1xf32>
    %c0_11 = arith.constant 0 : index
    %c0_12 = arith.constant 0 : index
    %24 = vector.load %arg6[%c0_11, %c0_12] : memref<16x1xf32, #tpu.memory_space<vmem>>, vector<16x1xf32>
    tpu.vector_store %arg6[%c0_11, %c0_12], %23 {strides = array<i32>} : memref<16x1xf32, #tpu.memory_space<vmem>>, vector<16x1xf32>,
    %c0_13 = arith.constant 0 : index
    %c0_14 = arith.constant 0 : index
    %25 = vector.load %arg5[%c0_13, %c0_14] : memref<16x1xf32, #tpu.memory_space<vmem>>, vector<16x1xf32>
    tpu.vector_store %arg5[%c0_13, %c0_14], %9 {strides = array<i32>} : memref<16x1xf32, #tpu.memory_space<vmem>>, vector<16x1xf32>,
    %c128_i32 = arith.constant 128 : i32
    %26 = arith.muli %arg1, %c128_i32 : i32
    %27 = vector.broadcast %26 : i32 to vector<16x1xi32>
    %28 = arith.subi %4, %27 : vector<16x1xi32>
    %29 = vector.broadcast %28 : vector<16x1xi32> to vector<16x128xi32>
    %30 = arith.cmpi eq, %5, %29 : vector<16x128xi32>
    %cst_15 = arith.constant 0.000000e+00 : f32
    %31 = vector.broadcast %cst_15 : f32 to vector<16x128xf32>
    %32 = arith.select %30, %3, %31 : vector<16x128xi1>, vector<16x128xf32>
    %c0_16 = arith.constant 0 : index
    %c0_17 = arith.constant 0 : index
    %33 = vector.load %arg7[%c0_16, %c0_17] : memref<16x1xf32, #tpu.memory_space<vmem>>, vector<16x1xf32>
    %cst_18 = arith.constant dense<0.000000e+00> : vector<16xf32>
    %34 = vector.multi_reduction <add>, %32, %cst_18 [1] : vector<16x128xf32> to vector<16xf32>
    %35 = vector.shape_cast %34 : vector<16xf32> to vector<16x1xf32>
    %36 = arith.addf %33, %35 : vector<16x1xf32>
    %c0_19 = arith.constant 0 : index
    %c0_20 = arith.constant 0 : index
    %37 = vector.load %arg7[%c0_19, %c0_20] : memref<16x1xf32, #tpu.memory_space<vmem>>, vector<16x1xf32>
    tpu.vector_store %arg7[%c0_19, %c0_20], %36 {strides = array<i32>} : memref<16x1xf32, #tpu.memory_space<vmem>>, vector<16x1xf32>,
    %c0_i32_21 = arith.constant 0 : i32
    %38 = arith.cmpi eq, %arg1, %c0_i32_21 : i32
    %39 = arith.extui %38 : i1 to i32
    %c0_i32_22 = arith.constant 0 : i32
    %40 = arith.cmpi ne, %39, %c0_i32_22 : i32
    scf.if %40 {
      %c-100_i32 = arith.constant -100 : i32
      %41 = vector.broadcast %c-100_i32 : i32 to vector<16x1xi32>
      %42 = arith.cmpi ne, %4, %41 : vector<16x1xi32>
      %c0_23 = arith.constant 0 : index
      %c0_24 = arith.constant 0 : index
      %43 = vector.load %arg5[%c0_23, %c0_24] : memref<16x1xf32, #tpu.memory_space<vmem>>, vector<16x1xf32>
      %c0_25 = arith.constant 0 : index
      %c0_26 = arith.constant 0 : index
      %44 = vector.load %arg6[%c0_25, %c0_26] : memref<16x1xf32, #tpu.memory_space<vmem>>, vector<16x1xf32>
      %45 = math.log %44 : vector<16x1xf32>
      %46 = arith.addf %43, %45 : vector<16x1xf32>
      %c0_27 = arith.constant 0 : index
      %c0_28 = arith.constant 0 : index
      %47 = vector.load %arg7[%c0_27, %c0_28] : memref<16x1xf32, #tpu.memory_space<vmem>>, vector<16x1xf32>
      %48 = arith.subf %46, %47 : vector<16x1xf32>
      %cst_29 = arith.constant 0.000000e+00 : f32
      %49 = vector.broadcast %cst_29 : f32 to vector<16x1xf32>
      %50 = arith.select %42, %48, %49 : vector<16x1xi1>, vector<16x1xf32>
      %c0_30 = arith.constant 0 : index
      %c0_31 = arith.constant 0 : index
      %51 = vector.load %arg4[%c0_30, %c0_31] : memref<16x1xf32, #tpu.memory_space<vmem>>, vector<16x1xf32>
      tpu.vector_store %arg4[%c0_30, %c0_31], %50 {strides = array<i32>} : memref<16x1xf32, #tpu.memory_space<vmem>>, vector<16x1xf32>,
    } else {
    }
    return
  }
  func.func @transform_0(%arg0: i32, %arg1: i32) -> (i32, i32) {
    %c0_i32 = arith.constant 0 : i32
    return %arg0, %arg1 : i32, i32
  }
  func.func @transform_1(%arg0: i32, %arg1: i32) -> (i32, i32) {
    %c0_i32 = arith.constant 0 : i32
    %c0_i32_0 = arith.constant 0 : i32
    return %arg0, %c0_i32 : i32, i32
  }
  func.func @transform_2(%arg0: i32, %arg1: i32) -> (i32, i32) {
    %c0_i32 = arith.constant 0 : i32
    %c0_i32_0 = arith.constant 0 : i32
    return %arg0, %c0_i32 : i32, i32
  }
}

</mosaic_0001>

<bundles_post_ra>
// kernel: tpu_custom_call.1
= control target key start
LH: loop header
LB: loop body
LE: loop exit
PB: predicated region body
PF: predicated region fallthrough
CT: control target
= control target key end

     0   :  { %vm15_vm0 = vcmask 7168   ;;  %v145_v1 = vmov -inf   ;;  %v146_v3 = vmov 0   ;;  %v147_v4 = vmov 0.0   ;;  %s203_s0 = inlined_call_operand.vmem [shape: f32[16,128], index: 0, kind: input, shape index: {}]   ;;  %s204_s1 = inlined_call_operand.vmem [shape: s32[16,1], index: 1, kind: input, shape index: {}]   ;;  %s205_s2 = inlined_call_operand.vmem [shape: f32[16,1], index: 2, kind: output, shape index: {}]  }
   0x1   :  { %v22_v0 = vld [vmem:[%s203_s0] sm:$0xff]  ;;  %16 = vst.msk [vmem:[#allocation2] sm:$0xff] %vm15_vm0, %v145_v1  ;;  %17 = vst.msk [vmem:[#allocation2 + $0x8] sm:$0xff] %vm15_vm0, %v145_v1  ;;  %v23_v2 = vld [vmem:[%s203_s0 + $0x8] sm:$0xff]  ;;  %131 = vset.pattern.permute.xlu1 %v146_v3  ;;  %132 = vset.pattern.permute.xlu0 %v146_v3  ;;  %v26_v13 = vlaneseq }
   0x2   :  { %28 = vmax.xlane.f32.xlu0 %v22_v0  ;;  %18 = vst.msk [vmem:[#allocation3] sm:$0xff] %vm15_vm0, %v147_v4  ;;  %19 = vst.msk [vmem:[#allocation3 + $0x8] sm:$0xff] %vm15_vm0, %v147_v4  ;;  %v178_v5 = vld [vmem:[%s204_s1] sm:$0xff]  ;;  %v186_v12 = vld [vmem:[%s204_s1 + $0x8] sm:$0xff] }
   0x3   :  { %20 = vst.msk [vmem:[#allocation4] sm:$0xff] %vm15_vm0, %v147_v4  ;;  %21 = vst.msk [vmem:[#allocation4 + $0x8] sm:$0xff] %vm15_vm0, %v147_v4  ;;  %v27_v14 = vand.u32 127, %v26_v13  ;;  %vm104_vm5 = vcmp.ne.s32.totalorder %v178_v5, 4294967196  ;;  %vm105_vm6 = vcmp.ne.s32.totalorder %v186_v12, 4294967196 }
   0x6   :  { %30 = vmax.xlane.f32.xlu0 %v23_v2 }
   0x8   :  { %v32_v6 = vld [vmem:[#allocation2] sm:$0xff]  ;;  %v33_v9 = vld [vmem:[#allocation2 + $0x8] sm:$0xff] }
   0x9   :  { %vm36_vm3 = vcmp.eq.f32.partialorder %v32_v6, -inf  ;;  %v62_v36 = vld [vmem:[#allocation3] sm:$0xff]  ;;  %vm37_vm4 = vcmp.eq.f32.partialorder %v33_v9, -inf  ;;  %v63_v40 = vld [vmem:[#allocation3 + $0x8] sm:$0xff] }
   0xa   :  { %v91_v27 = vld [vmem:[#allocation4] sm:$0xff]  ;;  %v92_v46 = vld [vmem:[#allocation4 + $0x8] sm:$0xff] }
  0x1c   :  { %82 = vperm.xlu0 %132, %v178_v5  }
  0x8f   :  { %v29_v7 = vpop.xlane.xlu0 %28 }
  0x90   :  { %v34_v8 = vmax.f32 %v32_v6, %v29_v7 }
  0x92   :  { %75 = vst.msk [vmem:[#allocation2] sm:$0xff] %vm15_vm0, %v34_v8  ;;  %48 = vperm.xlu1 %131, %v34_v8   ;;  %v38_v30 = vsub.f32 %v32_v6, %v34_v8 }
  0x93   :  { %v31_v10 = vpop.xlane.xlu0 %30 }
  0x94   :  { %v35_v11 = vmax.f32 %v33_v9, %v31_v10  ;;  %v40_v31 = vmul.f32 1.442695, %v38_v30 }
  0x96   :  { %76 = vst.msk [vmem:[#allocation2 + $0x8] sm:$0xff] %vm15_vm0, %v35_v11  ;;  %53 = vperm.xlu1 %131, %v35_v11   ;;  %v39_v32 = vsub.f32 %v33_v9, %v35_v11 }
  0x98   :  { %v42_v33 = vmul.f32 1.442695, %v39_v32 }
  0x99   :  { %v106_v53 = vld [vmem:[#allocation2] sm:$0xff] }
  0x9a   :  { %85 = vperm.xlu1 %131, %v186_v12  }
  0x9b   :  { %v83_v15 = vpop.permute.xlu0 %82 }
  0x9c   :  { %vm87_vm1 = vcmp.eq.s32.totalorder %v27_v14, %v83_v15 }
  0x9d   :  { %v89_v16 = vsel %vm87_vm1, %v22_v0, 0.0  ;;  %v107_v59 = vld [vmem:[#allocation2 + $0x8] sm:$0xff] }
  0x9e   :  { %93 = vadd.xlane.f32.xlu0 %v89_v16 }
 0x111   :  { %v49_v17 = vpop.permute.xlu1 %48 }
 0x112   :  { %v56_v18 = vsub.f32 %v22_v0, %v49_v17 }
 0x114   :  { %v58_v19 = vmul.f32 1.442695, %v56_v18 }
 0x115   :  { %v54_v20 = vpop.permute.xlu1 %53 }
 0x116   :  { %133 = vpow2.f32 %v58_v19  ;;  %v57_v21 = vsub.f32 %v23_v2, %v54_v20 }
 0x118   :  { %v60_v22 = vmul.f32 1.442695, %v57_v21 }
 0x119   :  { %v86_v24 = vpop.permute.xlu1 %85 }
 0x11a   :  { %135 = vpow2.f32 %v60_v22  ;;  %vm88_vm2 = vcmp.eq.s32.totalorder %v27_v14, %v86_v24 }
 0x11b   :  { %v90_v26 = vsel %vm88_vm2, %v23_v2, 0.0  ;;  %137 = vpow2.f32 %v40_v31 }
 0x11c   :  { %139 = vpow2.f32 %v42_v33 }
 0x120   :  { %v134_v23 = vpop.eup %133 }
 0x121   :  { %66 = vadd.xlane.f32.xlu1 %v134_v23 }
 0x124   :  { %v136_v25 = vpop.eup %135 }
 0x125   :  { %68 = vadd.xlane.f32.xlu1 %v136_v25  ;;  %v138_v34 = vpop.eup %137 }
 0x126   :  { %v44_v35 = vsel %vm36_vm3, 0.0, %v138_v34  ;;  %v140_v37 = vpop.eup %139 }
 0x127   :  { %v64_v38 = vmul.f32 %v62_v36, %v44_v35  ;;  %v45_v41 = vsel %vm37_vm4, 0.0, %v140_v37 }
 0x128   :  { %v65_v43 = vmul.f32 %v63_v40, %v45_v41 }
 0x129   :  { %95 = vadd.xlane.f32.xlu1 %v90_v26 }
 0x12b   :  { %v94_v28 = vpop.xlane.xlu0 %93 }
 0x12c   :  { %v97_v29 = vadd.f32 %v94_v28, %v91_v27 }
 0x12e   :  { %99 = vst.msk [vmem:[#allocation4] sm:$0xff] %vm15_vm0, %v97_v29 }
 0x135   :  { %v116_v54 = vld [vmem:[#allocation4] sm:$0xff] }
 0x1ae   :  { %v67_v39 = vpop.xlane.xlu1 %66 }
 0x1af   :  { %v70_v42 = vadd.f32 %v67_v39, %v64_v38 }
 0x1b1   :  { %73 = vst.msk [vmem:[#allocation3] sm:$0xff] %vm15_vm0, %v70_v42 }
 0x1b2   :  { %v69_v44 = vpop.xlane.xlu1 %68 }
 0x1b3   :  { %v71_v45 = vadd.f32 %v69_v44, %v65_v43 }
 0x1b5   :  { %74 = vst.msk [vmem:[#allocation3 + $0x8] sm:$0xff] %vm15_vm0, %v71_v45 }
 0x1b6   :  { %v96_v47 = vpop.xlane.xlu1 %95 }
 0x1b7   :  { %v98_v48 = vadd.f32 %v96_v47, %v92_v46 }
 0x1b8   :  { %v108_v49 = vld [vmem:[#allocation3] sm:$0xff] }
 0x1b9   :  { %141 = vlog2.f32 %v108_v49  ;;  %100 = vst.msk [vmem:[#allocation4 + $0x8] sm:$0xff] %vm15_vm0, %v98_v48 }
 0x1bc   :  { %v109_v50 = vld [vmem:[#allocation3 + $0x8] sm:$0xff] }
 0x1bd   :  { %143 = vlog2.f32 %v109_v50 }
 0x1c0   :  { %v117_v62 = vld [vmem:[#allocation4 + $0x8] sm:$0xff] }
 0x1c3   :  { %v142_v51 = vpop.eup %141 }
 0x1c4   :  { %v111_v52 = vmul.f32 0.6931472, %v142_v51 }
 0x1c6   :  { %v114_v55 = vadd.f32 %v111_v52, %v106_v53 }
 0x1c7   :  { %v144_v56 = vpop.eup %143 }
 0x1c8   :  { %v113_v57 = vmul.f32 0.6931472, %v144_v56  ;;  %v118_v58 = vsub.f32 %v114_v55, %v116_v54 }
 0x1ca   :  { %v115_v60 = vadd.f32 %v113_v57, %v107_v59  ;;  %v120_v61 = vsel %vm104_vm5, %v118_v58, 0.0 }
 0x1cb   :  { %122 = vst.msk [vmem:[%s205_s2] sm:$0xff] %vm15_vm0, %v120_v61 }
 0x1cc   :  { %v119_v63 = vsub.f32 %v115_v60, %v117_v62 }
 0x1ce   :  { %v121_v0 = vsel %vm105_vm6, %v119_v63, 0.0 }
 0x1cf   :  { %123 = vst.msk [vmem:[%s205_s2 + $0x8] sm:$0xff] %vm15_vm0, %v121_v0 }

</bundles_post_ra>
